<compile_context>
chip_gen: v7x
topology: tpu7x:2x2x1
jax: 0.10.0
libtpu: 0.0.40
codegen_flags: <defaults>
</compile_context>

<pallas_src>
import functools

import jax
import jax.numpy as jnp
from jax.experimental import pallas as pl
from jax.experimental.pallas import tpu as pltpu


F_PAD = 128  # node-feature lane padding (all hidden dims here are <= 32)


def _round_up(x, m):
    return (x + m - 1) // m * m


def _pick_tile(n, candidates):
    for t in candidates:
        if n % t == 0:
            return t
    return candidates[-1]


def _pick_row_tile(n):
    # Prefer >= 2 row blocks so the "parallel" row axis can shard across the
    # two TensorCores on v7x megacore.
    for t in (1024, 512, 256, 128):
        if n % t == 0 and n // t >= 2:
            return t
    return 128


# ---------------- fused aggregation + linear (+relu) Pallas kernel ----------
# out = [relu]((h + A @ h) @ W1) [optionally @ W2 + relu]   (GIN eps=0 style)
#
#   A tile      (tm, tk)       int8 in HBM (0/1 -> exact), cast to bf16
#                              in-kernel right before the MXU dot.
#   h resident  (Np, F_PAD)    f32, fetched once and kept in VMEM; contraction
#                              block (bf16 cast) and self term (f32) are both
#                              sliced from it.
#   W1 / W2     (F_PAD, F_PAD) bf16, resident (epilogue matmuls, f32 accum).
def _agg_linear_kernel(a_ref, h_ref, w1_ref, *rest, tm, tk, relu1, fuse_w2,
                       relu2):
    if fuse_w2:
        w2_ref, o_ref, acc_ref = rest
    else:
        o_ref, acc_ref = rest
        w2_ref = None

    i = pl.program_id(0)
    kk = pl.program_id(1)

    @pl.when(kk == 0)
    def _():
        acc_ref[...] = jnp.zeros_like(acc_ref)

    # int8 -> bf16 is exact for 0/1 adjacency entries; routed via f32 to keep
    # the conversion path simple.  Cost is ~2 VPU passes per tile, well under
    # the int8 tile DMA time, so the kernel stays HBM-bound with half the bytes.
    a_bf = a_ref[...].astype(jnp.float32).astype(jnp.bfloat16)
    k_start = pl.multiple_of(kk * tk, tk)
    h_blk = h_ref[pl.ds(k_start, tk), :].astype(jnp.bfloat16)
    acc_ref[...] += jnp.dot(a_bf, h_blk, preferred_element_type=jnp.float32)

    @pl.when(kk == pl.num_programs(1) - 1)
    def _():
        r_start = pl.multiple_of(i * tm, tm)
        z = h_ref[pl.ds(r_start, tm), :] + acc_ref[...]      # h + A @ h  (f32)
        # TODO(synk): epilogue matmuls run in bf16 for MXU throughput; the
        # <=32-wide layers feeding the k=1000 step function lose a little
        # precision vs a pure-f32 reference.
        z = jnp.dot(z.astype(jnp.bfloat16), w1_ref[...],
                    preferred_element_type=jnp.float32)
        if relu1:
            z = jnp.maximum(z, 0.0)
        if fuse_w2:
            z = jnp.dot(z.astype(jnp.bfloat16), w2_ref[...],
                        preferred_element_type=jnp.float32)
            if relu2:
                z = jnp.maximum(z, 0.0)
        o_ref[...] = z                                        # lane-dense store


def aggregate_linear_padded(a_i8, h_pad, w1_bf, w2_bf=None, *, relu1=True,
                            relu2=False):
    """Fused aggregation layer on padded operands.

    a_i8:  (Np, Np) int8 zero-padded adjacency, A[dst, src] in {0, 1}.
    h_pad: (Np, F_PAD) f32 node features, zero outside the valid block.
    w1_bf / w2_bf: (F_PAD, F_PAD) bf16 zero-padded weights.
    Returns (Np, F_PAD) f32 with the valid block in the top-left corner and
    exact zeros elsewhere (so it can be chained without re-padding).
    """
    np_ = a_i8.shape[0]
    tm = _pick_row_tile(np_)
    tk = _pick_tile(np_, (2048, 1024, 512, 256, 128))
    fuse = w2_bf is not None

    kernel = functools.partial(_agg_linear_kernel, tm=tm, tk=tk, relu1=relu1,
                               fuse_w2=fuse, relu2=relu2)

    in_specs = [
        pl.BlockSpec((tm, tk), lambda i, k: (i, k)),          # A tile (int8)
        pl.BlockSpec((np_, F_PAD), lambda i, k: (0, 0)),      # h resident f32
        pl.BlockSpec((F_PAD, F_PAD), lambda i, k: (0, 0)),    # W1 resident
    ]
    args = [a_i8, h_pad, w1_bf]
    if fuse:
        in_specs.append(pl.BlockSpec((F_PAD, F_PAD), lambda i, k: (0, 0)))
        args.append(w2_bf)

    # TODO(synk): for Np >~ 32K the resident h (Np*512 B f32) should fall back
    # to a streamed per-k block to respect v7x's 64 MiB VMEM.
    n_w = 2 if fuse else 1
    vmem_est = (2 * tm * tk                      # A int8, double-buffered
                + 2 * np_ * F_PAD * 4            # resident h (worst case 2x)
                + 2 * n_w * F_PAD * F_PAD * 2    # resident weights
                + 2 * tm * F_PAD * 4             # output, double-buffered
                + tm * F_PAD * 4)                # f32 accumulator scratch
    vmem_limit = int(min(vmem_est + (8 << 20), 64 << 20))

    return pl.pallas_call(
        kernel,
        out_shape=jax.ShapeDtypeStruct((np_, F_PAD), jnp.float32),
        grid=(np_ // tm, np_ // tk),
        in_specs=in_specs,
        out_specs=pl.BlockSpec((tm, F_PAD), lambda i, k: (i, 0)),
        scratch_shapes=[pltpu.VMEM((tm, F_PAD), jnp.float32)],
        compiler_params=pltpu.CompilerParams(
            dimension_semantics=("parallel", "arbitrary"),
            vmem_limit_bytes=vmem_limit),
    )(*args)


# ---------------- Pallas pairwise sign-difference row-sum kernel ------------
# D_i = sum_j tanh(k * (x_i - x_j) - eps),  O(N^2), EUP-bound on tanh.
def _pairwise_kernel(xr_ref, xc_ref, o_ref, acc_ref, *, k, epsilon, n_valid,
                     tc, need_mask):
    j = pl.program_id(1)
    last = pl.num_programs(1) - 1

    @pl.when(j == 0)
    def _():
        acc_ref[...] = jnp.zeros_like(acc_ref)

    xi = xr_ref[...]                                   # (tr, 1)
    xj = xc_ref[...]                                   # (1, tc)
    # TODO(synk): a bf16 tanh argument would ~double EUP throughput on
    # v6e/v7x but changes numerics with k=1000; kept f32 to match reference.
    d = jnp.tanh(k * (xi - xj) - epsilon)              # (tr, tc)

    def _accumulate(dd):
        # Lane-group adds into the lane-dense (tr, 128) accumulator: pure VPU
        # work (slack while the EUP grinds tanh), no per-step XLU reduce and
        # no per-step narrow (tr, 1) store.
        s = dd[:, 0:128]
        for g in range(1, tc // 128):
            s = s + dd[:, g * 128:(g + 1) * 128]
        acc_ref[...] += s

    if need_mask:
        @pl.when(j != last)
        def _():
            _accumulate(d)

        @pl.when(j == last)
        def _():
            # Padded-column mask only on the final column block.
            col = j * tc + jax.lax.broadcasted_iota(jnp.int32, d.shape, 1)
            _accumulate(jnp.where(col < n_valid, d, 0.0))
    else:
        _accumulate(d)

    @pl.when(j == last)
    def _():
        o_ref[...] = jnp.sum(acc_ref[...], axis=1, keepdims=True)


def pairwise_sign_rowsum(x_pad, n, k, epsilon):
    """x_pad: (Np, 1) f32 padded node values -> (n, 1) row sums."""
    np_ = x_pad.shape[0]
    tr = _pick_tile(np_, (512, 256, 128))
    tc = _pick_tile(np_, (2048, 1024, 512, 256, 128))
    x_col = x_pad.reshape(1, np_)
    kern = functools.partial(_pairwise_kernel, k=float(k),
                             epsilon=float(epsilon), n_valid=n, tc=tc,
                             need_mask=(np_ != n))
    out = pl.pallas_call(
        kern,
        out_shape=jax.ShapeDtypeStruct((np_, 1), jnp.float32),
        grid=(np_ // tr, np_ // tc),
        in_specs=[pl.BlockSpec((tr, 1), lambda i, j: (i, 0)),
                  pl.BlockSpec((1, tc), lambda i, j: (0, j))],
        out_specs=pl.BlockSpec((tr, 1), lambda i, j: (i, 0)),
        scratch_shapes=[pltpu.VMEM((tr, 128), jnp.float32)],
        compiler_params=pltpu.CompilerParams(
            dimension_semantics=("parallel", "arbitrary")),
    )(x_pad, x_col)
    return out[:n, :]


# ------------------------------- glue (JAX) ---------------------------------
def _pad_feat(h, np_):
    n, f = h.shape
    return jnp.zeros((np_, F_PAD), jnp.float32).at[:n, :f].set(
        h.astype(jnp.float32))


def _pad_w(w):
    fin, fout = w.shape
    return jnp.zeros((F_PAD, F_PAD), jnp.bfloat16).at[:fin, :fout].set(
        w.astype(jnp.bfloat16))


def segment_softmax(logits, batch, num_segments):
    m = jax.ops.segment_max(logits, batch, num_segments=num_segments)
    z = jnp.exp(logits - m[batch])
    s = jax.ops.segment_sum(z, batch, num_segments=num_segments)
    return z / s[batch]


def init_params(key, gin_hidden, output_dim, gin_layers):
    keys = jax.random.split(key, 8)

    def w(kk, shape, scale=0.2):
        return scale * jax.random.normal(kk, shape, jnp.float32)

    params = {
        "ic1_w": w(keys[0], (1, 8)),
        "ic2_w": w(keys[1], (8, 8)),
        "ic3_w": w(keys[2], (8, 1)),
        "indi_w": w(keys[3], (1, 1)),
        "f5_alpha": jnp.float32(1.0),
        "gin_out_w": w(keys[4], (gin_hidden, output_dim)),
        "gin": [],
    }
    gk = jax.random.split(keys[5], gin_layers * 2)
    in_dim = 1
    for l in range(gin_layers):
        params["gin"].append({
            "w1": w(gk[2 * l], (in_dim, gin_hidden)),
            "w2": w(gk[2 * l + 1], (gin_hidden, gin_hidden)),
        })
        in_dim = gin_hidden
    return params


def isgnn_forward(params, x, A, batch, num_graphs, num_L=2,
                  k=1000.0, epsilon=5.0):
    N = x.shape[0]
    np_ = _round_up(N, 128)

    # Pad + cast the adjacency ONCE to int8 (exact for 0/1) and reuse it across
    # every aggregation call; the kernel casts tiles to bf16 on the fly.
    A_i8 = jnp.zeros((np_, np_), jnp.int8).at[:N, :N].set(A.astype(jnp.int8))

    # Pre-pad / pre-cast all small weight matrices once (bf16 epilogue).
    w_ic1 = _pad_w(params["ic1_w"])
    w_ic2 = _pad_w(params["ic2_w"])
    w_ic3 = _pad_w(params["ic3_w"])
    w_indi = _pad_w(params["indi_w"])
    gin_ws = [(_pad_w(l["w1"]), _pad_w(l["w2"])) for l in params["gin"]]
    gin_hidden = params["gin_out_w"].shape[0]

    counts = jax.ops.segment_sum(jnp.ones((N,), jnp.float32), batch,
                                 num_segments=num_graphs).astype(jnp.int32)
    cum = jnp.concatenate([jnp.zeros((1,), jnp.int32), jnp.cumsum(counts)])

    def f5(D):
        # TODO(synk): DynamicTrainableStepFunctionF5_batch not provided; smooth
        # trainable per-graph step approximation as a stand-in.
        n_b = counts[batch].astype(jnp.float32)[:, None]
        return jax.nn.sigmoid(params["f5_alpha"] * (D + n_b - 1.0))

    def collect_pipeline(feat):
        # TODO(synk): exact InfoCollect definition not provided; using GIN-style
        # sum aggregation + linear + relu as a stand-in.  Features stay padded
        # across the three chained layers.
        h = _pad_feat(feat, np_)
        h = aggregate_linear_padded(A_i8, h, w_ic1, relu1=True)
        h = aggregate_linear_padded(A_i8, h, w_ic2, relu1=True)
        h = aggregate_linear_padded(A_i8, h, w_ic3, relu1=True)
        # .t().view(-1, 1) in the reference is a no-op on values; column 0 of
        # the padded output is the (Np, 1) node value vector.
        D = pairwise_sign_rowsum(h[:, 0:1], N, k, epsilon)   # Pallas O(N^2)
        return f5(D)

    def indi(y):
        # TODO(synk): exact IndiiLayer definition not provided; sum aggregation
        # + linear (no relu) as a stand-in.
        h = _pad_feat(y, np_)
        h = aggregate_linear_padded(A_i8, h, w_indi, relu1=False)
        return h[:N, 0:1]

    # note: reference inits y as ones((2N,1)) but overwrites it before use.
    y = jnp.ones((N, 1), jnp.float32)
    per_graph_idx = (jnp.arange(N, dtype=jnp.int32) - cum[batch]).astype(
        jnp.float32)
    node_indices = []

    for i in range(num_L):
        feat = x if i == 0 else y
        y = collect_pipeline(feat)
        out = indi(y)
        relu_out = jax.nn.relu(out)[:, 0]
        p = segment_softmax(relu_out / 0.1, batch, num_graphs)
        expected_indices = jax.ops.segment_sum(p * per_graph_idx, batch,
                                               num_segments=num_graphs)
        node_indices.append(expected_indices[:, None])
        p = segment_softmax(relu_out / 0.5, batch, num_graphs)
        combined = p[:, None] * relu_out[:, None]
        y = combined + y

    y = collect_pipeline(y)

    # GIN model (eps=0 per layer): aggregation + BOTH MLP linears + relus are
    # fused into one Pallas call per layer; only the tiny (32,4) projection and
    # the pooling stay in XLA.
    h_pad = _pad_feat(y, np_)
    for (w1, w2) in gin_ws:
        h_pad = aggregate_linear_padded(A_i8, h_pad, w1, w2,
                                        relu1=True, relu2=True)
    h = h_pad[:N, :gin_hidden]
    res = jnp.dot(h, params["gin_out_w"])
    res = jax.ops.segment_sum(res, batch, num_segments=num_graphs)
    return res, node_indices


if __name__ == "__main__":
    key = jax.random.PRNGKey(0)
    k_x, k_p = jax.random.split(key)

    num_graphs = 2
    nodes_per_graph = 8
    N = num_graphs * nodes_per_graph

    x = jax.random.normal(k_x, (N, 1), jnp.float32)
    batch = jnp.repeat(jnp.arange(num_graphs, dtype=jnp.int32),
                       nodes_per_graph)

    # ring graph within each component, both edge directions
    src, dst = [], []
    for g in range(num_graphs):
        base = g * nodes_per_graph
        for i in range(nodes_per_graph):
            a_, b_ = base + i, base + (i + 1) % nodes_per_graph
            src += [a_, b_]
            dst += [b_, a_]
    src = jnp.array(src, jnp.int32)
    dst = jnp.array(dst, jnp.int32)
    A = jnp.zeros((N, N), jnp.float32).at[dst, src].add(1.0)  # A[dst, src] = 1

    params = init_params(k_p, gin_hidden=32, output_dim=4, gin_layers=2)

    res, node_indices = isgnn_forward(params, x, A, batch, num_graphs,
                                      num_L=2, k=1000.0, epsilon=5.0)
    jax.block_until_ready(res)
    for t in node_indices:
        jax.block_until_ready(t)

    assert res.shape == (num_graphs, 4)
    assert len(node_indices) == 2 and node_indices[0].shape == (num_graphs, 1)
    print("KERNEL_OK")
</pallas_src>

<mosaic_0001>
module attributes {stable_mosaic.version = 11 : i64} {
  func.func @_agg_linear_kernel(%arg0: i32, %arg1: i32, %arg2: memref<128x128xi8, #tpu.memory_space<vmem>>, %arg3: memref<128x128xf32, #tpu.memory_space<vmem>>, %arg4: memref<128x128xbf16, #tpu.memory_space<vmem>>, %arg5: memref<128x128xf32, #tpu.memory_space<vmem>>, %arg6: memref<128x128xf32, #tpu.memory_space<vmem>>) attributes {dimension_semantics = [#tpu.dimension_semantics<parallel>, #tpu.dimension_semantics<arbitrary>], iteration_bounds = array<i64: 1, 1>, scalar_prefetch = 0 : i64, scratch_operands = 1 : i64, tpu.core_type = #tpu.core_type<tc>, window_params = [{transform_indices = @transform_0, window_bounds = array<i64: 128, 128>}, {pipeline_mode = #tpu.pipeline_mode<synchronous>, transform_indices = @transform_1, window_bounds = array<i64: 128, 128>}, {pipeline_mode = #tpu.pipeline_mode<synchronous>, transform_indices = @transform_2, window_bounds = array<i64: 128, 128>}, {transform_indices = @transform_3, window_bounds = array<i64: 128, 128>}]} {
    %c0_i32 = arith.constant 0 : i32
    %0 = arith.cmpi eq, %arg1, %c0_i32 : i32
    %1 = arith.extui %0 : i1 to i32
    %c0_i32_0 = arith.constant 0 : i32
    %2 = arith.cmpi ne, %1, %c0_i32_0 : i32
    scf.if %2 {
      %cst_9 = arith.constant 0.000000e+00 : f32
      %18 = vector.broadcast %cst_9 : f32 to vector<128x128xf32>
      %c0_10 = arith.constant 0 : index
      %c0_11 = arith.constant 0 : index
      %19 = vector.load %arg6[%c0_10, %c0_11] : memref<128x128xf32, #tpu.memory_space<vmem>>, vector<128x128xf32>
      tpu.vector_store %arg6[%c0_10, %c0_11], %18 {strides = array<i32>} : memref<128x128xf32, #tpu.memory_space<vmem>>, vector<128x128xf32>,
    } else {
    }
    %c0 = arith.constant 0 : index
    %c0_1 = arith.constant 0 : index
    %3 = vector.load %arg2[%c0, %c0_1] : memref<128x128xi8, #tpu.memory_space<vmem>>, vector<128x128xi8>
    %4 = arith.sitofp %3 : vector<128x128xi8> to vector<128x128xf32>
    %5 = arith.truncf %4 : vector<128x128xf32> to vector<128x128xbf16>
    %c128_i32 = arith.constant 128 : i32
    %6 = arith.muli %arg1, %c128_i32 : i32
    %7 = tpu.assume_multiple %6, 128 : i32
    %8 = arith.index_cast %7 : i32 to index
    %c0_2 = arith.constant 0 : index
    %9 = vector.load %arg3[%8, %c0_2] : memref<128x128xf32, #tpu.memory_space<vmem>>, vector<128x128xf32>
    %10 = arith.truncf %9 : vector<128x128xf32> to vector<128x128xbf16>
    %c0_3 = arith.constant 0 : index
    %c0_4 = arith.constant 0 : index
    %11 = vector.load %arg6[%c0_3, %c0_4] : memref<128x128xf32, #tpu.memory_space<vmem>>, vector<128x128xf32>
    %cst = arith.constant dense<0.000000e+00> : vector<128x128xf32>
    %12 = tpu.matmul %5, %10, %cst {dimension_numbers = #tpu.dot_dimension_numbers<[1], [0], [0], [1], [0, 0, 1, 1], [], []>} : vector<128x128xbf16>, vector<128x128xbf16>, vector<128x128xf32> -> vector<128x128xf32>
    %13 = arith.addf %11, %12 : vector<128x128xf32>
    %c0_5 = arith.constant 0 : index
    %c0_6 = arith.constant 0 : index
    %14 = vector.load %arg6[%c0_5, %c0_6] : memref<128x128xf32, #tpu.memory_space<vmem>>, vector<128x128xf32>
    tpu.vector_store %arg6[%c0_5, %c0_6], %13 {strides = array<i32>} : memref<128x128xf32, #tpu.memory_space<vmem>>, vector<128x128xf32>,
    %c0_i32_7 = arith.constant 0 : i32
    %15 = arith.cmpi eq, %arg1, %c0_i32_7 : i32
    %16 = arith.extui %15 : i1 to i32
    %c0_i32_8 = arith.constant 0 : i32
    %17 = arith.cmpi ne, %16, %c0_i32_8 : i32
    scf.if %17 {
      %c128_i32_9 = arith.constant 128 : i32
      %18 = arith.muli %arg0, %c128_i32_9 : i32
      %19 = tpu.assume_multiple %18, 128 : i32
      %20 = arith.index_cast %19 : i32 to index
      %c0_10 = arith.constant 0 : index
      %21 = vector.load %arg3[%20, %c0_10] : memref<128x128xf32, #tpu.memory_space<vmem>>, vector<128x128xf32>
      %c0_11 = arith.constant 0 : index
      %c0_12 = arith.constant 0 : index
      %22 = vector.load %arg6[%c0_11, %c0_12] : memref<128x128xf32, #tpu.memory_space<vmem>>, vector<128x128xf32>
      %23 = arith.addf %21, %22 : vector<128x128xf32>
      %24 = arith.truncf %23 : vector<128x128xf32> to vector<128x128xbf16>
      %c0_13 = arith.constant 0 : index
      %c0_14 = arith.constant 0 : index
      %25 = vector.load %arg4[%c0_13, %c0_14] : memref<128x128xbf16, #tpu.memory_space<vmem>>, vector<128x128xbf16>
      %cst_15 = arith.constant dense<0.000000e+00> : vector<128x128xf32>
      %26 = tpu.matmul %24, %25, %cst_15 {dimension_numbers = #tpu.dot_dimension_numbers<[1], [0], [0], [1], [0, 0, 1, 1], [], []>} : vector<128x128xbf16>, vector<128x128xbf16>, vector<128x128xf32> -> vector<128x128xf32>
      %cst_16 = arith.constant 0.000000e+00 : f32
      %27 = vector.broadcast %cst_16 : f32 to vector<128x128xf32>
      %28 = arith.maximumf %26, %27 : vector<128x128xf32>
      %c0_17 = arith.constant 0 : index
      %c0_18 = arith.constant 0 : index
      %29 = vector.load %arg5[%c0_17, %c0_18] : memref<128x128xf32, #tpu.memory_space<vmem>>, vector<128x128xf32>
      tpu.vector_store %arg5[%c0_17, %c0_18], %28 {strides = array<i32>} : memref<128x128xf32, #tpu.memory_space<vmem>>, vector<128x128xf32>,
    } else {
    }
    return
  }
  func.func @transform_0(%arg0: i32, %arg1: i32) -> (i32, i32) {
    %c0_i32 = arith.constant 0 : i32
    return %arg0, %arg1 : i32, i32
  }
  func.func @transform_1(%arg0: i32, %arg1: i32) -> (i32, i32) {
    %c0_i32 = arith.constant 0 : i32
    %c0_i32_0 = arith.constant 0 : i32
    %c0_i32_1 = arith.constant 0 : i32
    return %c0_i32, %c0_i32_0 : i32, i32
  }
  func.func @transform_2(%arg0: i32, %arg1: i32) -> (i32, i32) {
    %c0_i32 = arith.constant 0 : i32
    %c0_i32_0 = arith.constant 0 : i32
    %c0_i32_1 = arith.constant 0 : i32
    return %c0_i32, %c0_i32_0 : i32, i32
  }
  func.func @transform_3(%arg0: i32, %arg1: i32) -> (i32, i32) {
    %c0_i32 = arith.constant 0 : i32
    %c0_i32_0 = arith.constant 0 : i32
    return %arg0, %c0_i32 : i32, i32
  }
}

</mosaic_0001>

<bundles_post_ra>
// kernel: tpu_custom_call.1
= control target key start
LH: loop header
LB: loop body
LE: loop exit
PB: predicated region body
PF: predicated region fallthrough
CT: control target
= control target key end

     0   :  { %8 = vsyncpa [#allocation4], 0  ;;  %s902_s0 = inlined_call_operand.hbm [shape: s8[128,128], index: 0, kind: input, shape index: {}]   ;;  %s903_s1 = inlined_call_operand.hbm [shape: f32[128,128], index: 1, kind: input, shape index: {}]   ;;  %s904_s2 = inlined_call_operand.hbm [shape: bf16[128,128], index: 2, kind: input, shape index: {}]   ;;  %s905_s3 = inlined_call_operand.hbm [shape: f32[128,128], index: 3, kind: output, shape index: {}]  }
   0x1   :  { %9 = vsyncpa [#allocation7], 0 }
   0x2   :  { %10 = vsyncpa [#allocation5], 0  ;;  %s746_s12 = smov [#allocation6]   ;;  %s747_s14 = smov [#allocation3]  }
   0x3   :  { %s28_s13 = sshll.u32 %s746_s12, 4  ;;  %s16_s15 = sshll.u32 %s747_s14, 4  ;;  %s29_s13 = int_to_ptr.vmem [resolvable:$true] %s28_s13  ;;  %s774_s15 = int_to_ptr.vmem [resolvable:$true] %s16_s15 }
   0x4   :  { %s652_s18 = scalar_lea.hbm %s903_s1, 2048 }
   0x5   :  { %p653_p0 = scmp.ne.s32.totalorder %s903_s1, %s652_s18  ;;  %p656_p1 = scmp.lt.u32.totalorder %s652_s18, %s903_s1 }
   0x7   :  { %p658_p2 = pnand %p656_p1, %p653_p0 }
   0x9   :  { %661 = shalt.err (!%p658_p2)
}
   0xa   :  { %s662_s23 = scalar_lea.vmem %s29_s13, 2048  ;;  %p667_p4 = scmp.lt.s32.totalorder %s29_s13, %s29_s13 }
   0xb   :  { %p663_p3 = scmp.ne.s32.totalorder %s29_s13, %s662_s23  ;;  %p668_p5 = scmp.lt.s32.totalorder %s662_s23, %s662_s23 }
   0xd   :  { %p669_p6 = por %p668_p5, %p667_p4 }
   0xf   :  { %p670_p7 = pnand %p669_p6, %p663_p3 }
  0x11   :  { %673 = shalt.err (!%p670_p7)
}
  0x12   :  { %s748_s24 = smov 128   ;;  %s749_s25 = smov 8  }
  0x13   :  { %34 = dma.hbm_to_vmem [thread:$0]  %s903_s1, 2048, %s29_s13, [#allocation7], %s748_s24, %s748_s24, %s749_s25  }
  0x14   :  { %s674_s30 = scalar_lea.hbm %s902_s0, 512 }
  0x15   :  { %p675_p8 = scmp.ne.s32.totalorder %s902_s0, %s674_s30  ;;  %p678_p9 = scmp.lt.u32.totalorder %s674_s30, %s902_s0 }
  0x17   :  { %p680_p10 = pnand %p678_p9, %p675_p8 }
  0x19   :  { %683 = shalt.err (!%p680_p10)
}
  0x1a   :  { %s684_s8 = scalar_lea.vmem %s774_s15, 512  ;;  %p689_p12 = scmp.lt.s32.totalorder %s774_s15, %s774_s15 }
  0x1b   :  { %p685_p11 = scmp.ne.s32.totalorder %s774_s15, %s684_s8  ;;  %p690_p13 = scmp.lt.s32.totalorder %s684_s8, %s684_s8 }
  0x1d   :  { %p691_p0 = por %p690_p13, %p689_p12 }
  0x1f   :  { %p692_p1 = pnand %p691_p0, %p685_p11 }
  0x21   :  { %695 = shalt.err (!%p692_p1)
}
  0x22   :  { %22 = dma.hbm_to_vmem [thread:$0]  %s902_s0, 512, %s774_s15, [#allocation4], %s748_s24, %s748_s24, %s749_s25  }
  0x23   :  { %s750_s10 = smov [#allocation8]   ;;  %s696_s14 = scalar_lea.hbm %s904_s2, 1024 }
  0x24   :  { %s40_s11 = sshll.u32 %s750_s10, 4  ;;  %p697_p2 = scmp.ne.s32.totalorder %s904_s2, %s696_s14  ;;  %s41_s11 = int_to_ptr.vmem [resolvable:$true] %s40_s11 }
  0x25   :  { %p700_p3 = scmp.lt.u32.totalorder %s696_s14, %s904_s2 }
  0x27   :  { %p702_p4 = pnand %p700_p3, %p697_p2 }
  0x29   :  { %705 = shalt.err (!%p702_p4)
}
  0x2a   :  { %s706_s20 = scalar_lea.vmem %s41_s11, 1024  ;;  %p711_p6 = scmp.lt.s32.totalorder %s41_s11, %s41_s11 }
  0x2b   :  { %p707_p5 = scmp.ne.s32.totalorder %s41_s11, %s706_s20  ;;  %p712_p7 = scmp.lt.s32.totalorder %s706_s20, %s706_s20 }
  0x2d   :  { %p713_p8 = por %p712_p7, %p711_p6 }
  0x2f   :  { %p714_p9 = pnand %p713_p8, %p707_p5 }
  0x31   :  { %717 = shalt.err (!%p714_p9)
}
  0x32   :  { %s751_s0 = smov 64   ;;  %s752_s15 = smov 4  }
  0x33   :  { %46 = dma.hbm_to_vmem [thread:$0]  %s904_s2, 1024, %s41_s11, [#allocation7], %s751_s0, %s751_s0, %s752_s15  }
  0x34   :  { %740 = dma.done.wait [#allocation4], 512  }
  0x35   :  { %741 = vsyncadd [#allocation4], 4294966784 }
  0x36   :  { %742 = dma.done.wait [#allocation7], 3072  }
  0x37   :  { %743 = vsyncadd [#allocation7], 4294964224  ;;  %v823_v0 = vld [vmem:[#allocation6] sm:$0xff]  ;;  %v825_v1 = vld [vmem:[#allocation6 + $0x8] sm:$0xff]  ;;  %s753_s2 = smov [#allocation9]  }
  0x38   :  { %v827_v2 = vld [vmem:[#allocation6 + $0x10] sm:$0xff]  ;;  %v107_v3 = vpack.c.bf16 %v825_v1, %v823_v0  ;;  %v831_v4 = vld [vmem:[#allocation6 + $0x18] sm:$0xff]  ;;  %v835_v6 = vld [vmem:[#allocation6 + $0x20] sm:$0xff]  ;;  %s519_s23 = sshll.u32 %s753_s2, 4  ;;  %s520_s23 = int_to_ptr.vmem [resolvable:$true] %s519_s23 }
  0x39   :  { %v108_v5 = vpack.c.bf16 %v831_v4, %v827_v2  ;;  %v837_v7 = vld [vmem:[#allocation6 + $0x28] sm:$0xff]  ;;  %v77_v9 = vld [vmem:[#allocation3] sm:$0xff]  ;;  %v841_v10 = vld [vmem:[#allocation6 + $0x30] sm:$0xff]  ;;  %s718_s26 = scalar_lea.vmem %s520_s23, 2048  ;;  %p723_p11 = scmp.lt.s32.totalorder %s520_s23, %s520_s23 }
  0x3a   :  { %572 = vmatprep.subr.bf16.mxu0 %v107_v3  ;;  %v109_v8 = vpack.c.bf16 %v837_v7, %v835_v6  ;;  %v843_v11 = vld [vmem:[#allocation6 + $0x38] sm:$0xff]  ;;  %v81_v12 = vunpack.c.l.s8.bf16 %v77_v9  ;;  %v644_v13 = vld [vmem:[#allocation8] sm:$0xff]   ;;  %v645_v14 = vld [vmem:[#allocation8 + $0x8] sm:$0xff]   ;;  %v82_v33 = vunpack.c.h.s8.bf16 %v77_v9  ;;  %p719_p10 = scmp.ne.s32.totalorder %s520_s23, %s718_s26  ;;  %p724_p12 = scmp.lt.s32.totalorder %s718_s26, %s718_s26 }
  0x3b   :  { %573 = vmatpush3.bf16.msra.mxu0 %v107_v3  ;;  %v110_v15 = vpack.c.bf16 %v843_v11, %v841_v10  ;;  %v847_v16 = vld [vmem:[#allocation6 + $0x40] sm:$0xff]  ;;  %604 = vmatprep.subr.bf16.mxu1 %v644_v13  ;;  %v849_v17 = vld [vmem:[#allocation6 + $0x48] sm:$0xff]  ;;  %v646_v18 = vld [vmem:[#allocation8 + $0x10] sm:$0xff]  }
  0x3c   :  { %574 = vmatprep.subr.bf16.mxu0 %v108_v5  ;;  %588 = vmatprep.mubr.bf16.mxu0 %v81_v12  ;;  %v111_v19 = vpack.c.bf16 %v849_v17, %v847_v16  ;;  %v853_v20 = vld [vmem:[#allocation6 + $0x50] sm:$0xff]  ;;  %v855_v21 = vld [vmem:[#allocation6 + $0x58] sm:$0xff]  ;;  %v859_v24 = vld [vmem:[#allocation6 + $0x60] sm:$0xff]  ;;  %p725_p13 = por %p724_p12, %p723_p11 }
  0x3d   :  { %605 = vmatpush3.bf16.msra.mxu1 %v644_v13  ;;  %v647_v22 = vld [vmem:[#allocation8 + $0x18] sm:$0xff]   ;;  %v112_v23 = vpack.c.bf16 %v855_v21, %v853_v20  ;;  %v861_v25 = vld [vmem:[#allocation6 + $0x68] sm:$0xff]  ;;  %v648_v26 = vld [vmem:[#allocation8 + $0x20] sm:$0xff]  }
  0x3e   :  { %606 = vmatprep.subr.bf16.mxu1 %v645_v14  ;;  %v113_v27 = vpack.c.bf16 %v861_v25, %v859_v24  ;;  %v865_v28 = vld [vmem:[#allocation6 + $0x70] sm:$0xff]  ;;  %v867_v29 = vld [vmem:[#allocation6 + $0x78] sm:$0xff]  ;;  %v649_v30 = vld [vmem:[#allocation8 + $0x28] sm:$0xff]   ;;  %p726_p0 = pnand %p725_p13, %p719_p10 }
  0x3f   :  { %575 = vmatpush3.bf16.msra.mxu0 %v108_v5  ;;  %v114_v31 = vpack.c.bf16 %v867_v29, %v865_v28  ;;  %v78_v32 = vld [vmem:[#allocation3 + $0x8] sm:$0xff]  ;;  %v79_v35 = vld [vmem:[#allocation3 + $0x10] sm:$0xff]  ;;  %v80_v38 = vld [vmem:[#allocation3 + $0x18] sm:$0xff] }
  0x40   :  { %576 = vmatprep.subr.bf16.mxu0 %v109_v8  ;;  %v83_v34 = vunpack.c.l.s8.bf16 %v78_v32  ;;  %v84_v36 = vunpack.c.h.s8.bf16 %v78_v32  ;;  %v85_v37 = vunpack.c.l.s8.bf16 %v79_v35  ;;  %v86_v39 = vunpack.c.h.s8.bf16 %v79_v35  ;;  %v650_v42 = vld [vmem:[#allocation8 + $0x30] sm:$0xff]   ;;  %v651_v43 = vld [vmem:[#allocation8 + $0x38] sm:$0xff]  }
  0x41   :  { %607 = vmatpush3.bf16.msra.mxu1 %v645_v14  ;;  %v87_v40 = vunpack.c.l.s8.bf16 %v80_v38  ;;  %v88_v41 = vunpack.c.h.s8.bf16 %v80_v38 }
  0x42   :  { %608 = vmatprep.subr.bf16.mxu1 %v646_v18 }
  0x43   :  { %577 = vmatpush3.bf16.msra.mxu0 %v109_v8 }
  0x44   :  { %578 = vmatprep.subr.bf16.mxu0 %v110_v15 }
  0x45   :  { %609 = vmatpush3.bf16.msra.mxu1 %v646_v18 }
  0x46   :  { %610 = vmatprep.subr.bf16.mxu1 %v647_v22 }
  0x47   :  { %579 = vmatpush3.bf16.msra.mxu0 %v110_v15 }
  0x48   :  { %580 = vmatprep.subr.bf16.mxu0 %v111_v19 }
  0x49   :  { %611 = vmatpush3.bf16.msra.mxu1 %v647_v22 }
  0x4a   :  { %612 = vmatprep.subr.bf16.mxu1 %v648_v26 }
  0x4b   :  { %581 = vmatpush3.bf16.msra.mxu0 %v111_v19 }
  0x4c   :  { %582 = vmatprep.subr.bf16.mxu0 %v112_v23 }
  0x4d   :  { %613 = vmatpush3.bf16.msra.mxu1 %v648_v26 }
  0x4e   :  { %614 = vmatprep.subr.bf16.mxu1 %v649_v30 }
  0x4f   :  { %583 = vmatpush3.bf16.msra.mxu0 %v112_v23 }
  0x50   :  { %584 = vmatprep.subr.bf16.mxu0 %v113_v27 }
  0x51   :  { %615 = vmatpush3.bf16.msra.mxu1 %v649_v30 }
  0x52   :  { %616 = vmatprep.subr.bf16.mxu1 %v650_v42 }
  0x53   :  { %585 = vmatpush3.bf16.msra.mxu0 %v113_v27 }
  0x54   :  { %586 = vmatprep.subr.bf16.mxu0 %v114_v31 }
  0x55   :  { %617 = vmatpush3.bf16.msra.mxu1 %v650_v42 }
  0x56   :  { %618 = vmatprep.subr.bf16.mxu1 %v651_v43 }
  0x57   :  { %587 = vmatpush3.bf16.msra.mxu0 %v114_v31 }
  0x59   :  { %619 = vmatpush3.bf16.msra.mxu1 %v651_v43 }
  0x5a   :  { %589 = vmatmul.mubr.bf16.vlgmr.msra.gmra.mrb[0].mxu0 %v82_v33 }
  0x5b   :  { %592 = vmatprep.mubr.bf16.mxu0 %v83_v34 }
  0x62   :  { %593 = vmatmul.mubr.bf16.gmra.mrb[4].mxu0 %v84_v36 }
  0x63   :  { %596 = vmatprep.mubr.bf16.mxu0 %v85_v37 }
  0x6a   :  { %597 = vmatmul.mubr.bf16.gmra.mrb[8].mxu0 %v86_v39 }
  0x6b   :  { %600 = vmatprep.mubr.bf16.mxu0 %v87_v40 }
  0x72   :  { %601 = vmatmul.mubr.bf16.gmra.mrb[12].mxu0 %v88_v41 }
 0x12d   :  { %v590_v44 = vpop.f32.mrb[0].mxu0 }
 0x12e   :  { %v165_v45 = vpop.f32.mrb[1].mxu0  ;;  %v299_v47 = vadd.f32 %v590_v44, %v827_v2 }
 0x12f   :  { %v591_v46 = vpop.f32.mrb[2].mxu0  ;;  %v297_v50 = vadd.f32 %v165_v45, %v823_v0 }
 0x130   :  { %v300_v48 = vadd.f32 %v591_v46, %v831_v4  ;;  %v168_v49 = vpop.f32.mrb[3].mxu0 }
 0x131   :  { %v298_v51 = vadd.f32 %v168_v49, %v825_v1 }
 0x132   :  { %v314_v52 = vpack.c.bf16 %v300_v48, %v299_v47 }
 0x133   :  { %v313_v53 = vpack.c.bf16 %v298_v51, %v297_v50 }
 0x135   :  { %v594_v54 = vpop.f32.mrb[4].mxu0  ;;  %620 = vmatprep.mubr.bf16.mxu1 %v313_v53 }
 0x136   :  { %v181_v55 = vpop.f32.mrb[5].mxu0  ;;  %621 = vmatmul.mubr.bf16.vlgmr.msra.gmra.mrb[0].mxu1 %v314_v52  ;;  %v303_v57 = vadd.f32 %v594_v54, %v841_v10 }
 0x137   :  { %v595_v56 = vpop.f32.mrb[6].mxu0  ;;  %v301_v60 = vadd.f32 %v181_v55, %v835_v6 }
 0x138   :  { %v304_v58 = vadd.f32 %v595_v56, %v843_v11  ;;  %v184_v59 = vpop.f32.mrb[7].mxu0 }
 0x139   :  { %v302_v61 = vadd.f32 %v184_v59, %v837_v7 }
 0x13a   :  { %v316_v62 = vpack.c.bf16 %v304_v58, %v303_v57 }
 0x13b   :  { %v315_v63 = vpack.c.bf16 %v302_v61, %v301_v60 }
 0x13d   :  { %v598_v0 = vpop.f32.mrb[8].mxu0  ;;  %624 = vmatprep.mubr.bf16.mxu1 %v315_v63 }
 0x13e   :  { %v197_v1 = vpop.f32.mrb[9].mxu0  ;;  %625 = vmatmul.mubr.bf16.gmra.mrb[4].mxu1 %v316_v62  ;;  %v307_v3 = vadd.f32 %v598_v0, %v853_v20 }
 0x13f   :  { %v599_v2 = vpop.f32.mrb[10].mxu0  ;;  %v305_v8 = vadd.f32 %v197_v1, %v847_v16 }
 0x140   :  { %v308_v4 = vadd.f32 %v599_v2, %v855_v21  ;;  %v200_v5 = vpop.f32.mrb[11].mxu0 }
 0x141   :  { %v306_v9 = vadd.f32 %v200_v5, %v849_v17 }
 0x142   :  { %v318_v10 = vpack.c.bf16 %v308_v4, %v307_v3 }
 0x143   :  { %v317_v6 = vpack.c.bf16 %v306_v9, %v305_v8 }
 0x145   :  { %v602_v11 = vpop.f32.mrb[12].mxu0  ;;  %628 = vmatprep.mubr.bf16.mxu1 %v317_v6 }
 0x146   :  { %v213_v7 = vpop.f32.mrb[13].mxu0  ;;  %629 = vmatmul.mubr.bf16.gmra.mrb[8].mxu1 %v318_v10  ;;  %v311_v13 = vadd.f32 %v602_v11, %v865_v28 }
 0x147   :  { %v603_v12 = vpop.f32.mrb[14].mxu0  ;;  %v309_v18 = vadd.f32 %v213_v7, %v859_v24 }
 0x148   :  { %v312_v14 = vadd.f32 %v603_v12, %v867_v29  ;;  %v216_v15 = vpop.f32.mrb[15].mxu0 }
 0x149   :  { %v310_v19 = vadd.f32 %v216_v15, %v861_v25 }
 0x14a   :  { %v320_v20 = vpack.c.bf16 %v312_v14, %v311_v13 }
 0x14b   :  { %v319_v16 = vpack.c.bf16 %v310_v19, %v309_v18 }
 0x14d   :  { %632 = vmatprep.mubr.bf16.mxu1 %v319_v16 }
 0x14e   :  { %633 = vmatmul.mubr.bf16.gmra.mrb[12].mxu1 %v320_v20 }
 0x209   :  { %v622_v17 = vpop.f32.mrb[0].mxu1 }
 0x20a   :  { %v484_v21 = vmax.f32 %v622_v17, 0.0  ;;  %v419_v22 = vpop.f32.mrb[1].mxu1 }
 0x20b   :  { %v482_v23 = vmax.f32 %v419_v22, 0.0  ;;  %v623_v26 = vpop.f32.mrb[2].mxu1 }
 0x20c   :  { %500 = vst [vmem:[#allocation9 + $0x10] sm:$0xff] %v484_v21  ;;  %v485_v27 = vmax.f32 %v623_v26, 0.0  ;;  %v422_v30 = vpop.f32.mrb[3].mxu1 }
 0x20d   :  { %498 = vst [vmem:[#allocation9] sm:$0xff] %v482_v23  ;;  %v483_v28 = vmax.f32 %v422_v30, 0.0 }
 0x20e   :  { %501 = vst [vmem:[#allocation9 + $0x18] sm:$0xff] %v485_v27 }
 0x20f   :  { %499 = vst [vmem:[#allocation9 + $0x8] sm:$0xff] %v483_v28 }
 0x211   :  { %v626_v29 = vpop.f32.mrb[4].mxu1 }
 0x212   :  { %v488_v24 = vmax.f32 %v626_v29, 0.0  ;;  %v435_v31 = vpop.f32.mrb[5].mxu1 }
 0x213   :  { %v486_v25 = vmax.f32 %v435_v31, 0.0  ;;  %v627_v32 = vpop.f32.mrb[6].mxu1 }
 0x214   :  { %504 = vst [vmem:[#allocation9 + $0x30] sm:$0xff] %v488_v24  ;;  %v489_v33 = vmax.f32 %v627_v32, 0.0  ;;  %v438_v34 = vpop.f32.mrb[7].mxu1 }
 0x215   :  { %502 = vst [vmem:[#allocation9 + $0x20] sm:$0xff] %v486_v25  ;;  %v487_v35 = vmax.f32 %v438_v34, 0.0 }
 0x216   :  { %505 = vst [vmem:[#allocation9 + $0x38] sm:$0xff] %v489_v33 }
 0x217   :  { %503 = vst [vmem:[#allocation9 + $0x28] sm:$0xff] %v487_v35 }
 0x219   :  { %v630_v36 = vpop.f32.mrb[8].mxu1 }
 0x21a   :  { %v492_v37 = vmax.f32 %v630_v36, 0.0  ;;  %v451_v38 = vpop.f32.mrb[9].mxu1 }
 0x21b   :  { %v490_v39 = vmax.f32 %v451_v38, 0.0  ;;  %v631_v40 = vpop.f32.mrb[10].mxu1 }
 0x21c   :  { %508 = vst [vmem:[#allocation9 + $0x50] sm:$0xff] %v492_v37  ;;  %v493_v41 = vmax.f32 %v631_v40, 0.0  ;;  %v454_v42 = vpop.f32.mrb[11].mxu1 }
 0x21d   :  { %506 = vst [vmem:[#allocation9 + $0x40] sm:$0xff] %v490_v39  ;;  %v491_v43 = vmax.f32 %v454_v42, 0.0 }
 0x21e   :  { %509 = vst [vmem:[#allocation9 + $0x58] sm:$0xff] %v493_v41 }
 0x21f   :  { %507 = vst [vmem:[#allocation9 + $0x48] sm:$0xff] %v491_v43 }
 0x221   :  { %v634_v44 = vpop.f32.mrb[12].mxu1 }
 0x222   :  { %v496_v45 = vmax.f32 %v634_v44, 0.0  ;;  %v467_v46 = vpop.f32.mrb[13].mxu1 }
 0x223   :  { %v494_v47 = vmax.f32 %v467_v46, 0.0  ;;  %v635_v48 = vpop.f32.mrb[14].mxu1 }
 0x224   :  { %512 = vst [vmem:[#allocation9 + $0x70] sm:$0xff] %v496_v45  ;;  %v497_v49 = vmax.f32 %v635_v48, 0.0  ;;  %v470_v50 = vpop.f32.mrb[15].mxu1 }
 0x225   :  { %510 = vst [vmem:[#allocation9 + $0x60] sm:$0xff] %v494_v47  ;;  %v495_v51 = vmax.f32 %v470_v50, 0.0 }
 0x226   :  { %513 = vst [vmem:[#allocation9 + $0x78] sm:$0xff] %v497_v49 }
 0x227   :  { %511 = vst [vmem:[#allocation9 + $0x68] sm:$0xff] %v495_v51 }
 0x228   :  { %729 = shalt.err (!%p726_p0)
}
 0x229   :  { %s730_s29 = scalar_lea.hbm %s905_s3, 2048 }
 0x22a   :  { %p731_p1 = scmp.ne.s32.totalorder %s905_s3, %s730_s29  ;;  %p734_p2 = scmp.lt.u32.totalorder %s730_s29, %s905_s3 }
 0x22c   :  { %p736_p3 = pnand %p734_p2, %p731_p1 }
 0x22e   :  { %739 = shalt.err (!%p736_p3)
}
 0x22f   :  { %525 = dma.vmem_to_hbm [thread:$0]  %s520_s23, 2048, %s905_s3, [#allocation5], %s748_s24, %s748_s24, %s749_s25  }
 0x230   :  { %744 = dma.done.wait [#allocation5], 2048  }
 0x231   :  { %745 = vsyncadd [#allocation5], 4294965248 }
 0x232   :  { %529 = vsyncpa [#allocation4], 1 }
 0x233   :  { %530 = vsyncpa [#allocation7], 1 }
 0x234   :  { %531 = vsyncpa [#allocation5], 1 }

</bundles_post_ra>
